<compile_context>
chip_gen: v7x
topology: tpu7x:2x2x1
jax: 0.10.0
libtpu: 0.0.40
codegen_flags: <defaults>
</compile_context>

<pallas_src>
import functools

import jax
import jax.numpy as jnp
from jax.experimental import pallas as pl
from jax.experimental.pallas import tpu as pltpu

_LANES = 128
_MAX_TILE_ROWS = 2048   # (2048, 128) f32 block = 1 MiB; ~3 MiB VMEM incl. acc
_NCORES = 2             # leading "parallel" axis -> both TensorCores on v7x


def _hloss_kernel(x_ref, o_ref, acc_ref, *, total, tile_rows, blocks_per_core):
    p = pl.program_id(0)   # core-parallel axis
    i = pl.program_id(1)   # sequential reduction axis

    @pl.when(i == 0)
    def _():
        acc_ref[...] = jnp.zeros_like(acc_ref)

    x = x_ref[...].astype(jnp.float32)

    # Validity mask for the ragged tail, computed from *logical* indices so
    # partial last blocks and clamped overhang blocks contribute exactly 0.
    # Row/lane split avoids flat-index int32 overflow on huge tensors.
    blk = p * blocks_per_core + i
    row0 = blk * tile_rows
    row_idx = jax.lax.broadcasted_iota(jnp.int32, x.shape, 0) + row0
    lane_idx = jax.lax.broadcasted_iota(jnp.int32, x.shape, 1)
    full_rows = total // _LANES
    rem = total % _LANES
    valid = (row_idx < full_rows) | ((row_idx == full_rows) & (lane_idx < rem))

    # One exp per element, reused for both sigmoid and logsigmoid:
    #   t = exp(-|x|)
    #   logsigmoid(x) = min(x, 0) - log1p(t)
    #   sigmoid(x)    = 1/(1+t)  (x >= 0)   or   t/(1+t)  (x < 0)
    t = jnp.exp(-jnp.abs(x))
    logsig = jnp.minimum(x, 0.0) - jnp.log1p(t)
    # NOTE: pl.reciprocal(1.0 + t, approx=True) would move this to the EUP's
    # approximate path; kept exact here to hold ~1e-6 relative accuracy.
    r = 1.0 / (1.0 + t)
    sig = jnp.where(x >= 0.0, r, t * r)

    b = jnp.where(valid, -sig * logsig, 0.0)

    # Full-tile elementwise (VPU-only) accumulation; reduce once at the end.
    acc_ref[...] += b

    @pl.when(i == pl.num_programs(1) - 1)
    def _():
        o_ref[...] = jnp.sum(acc_ref[...]).reshape(1, 1, 1)


def hloss(x, *, max_tile_rows=_MAX_TILE_ROWS):
    """x: (N, C, H, W). Returns scalar f32: sum(-sigmoid(x)*logsigmoid(x)) / (N*H*W)."""
    n, c, h, w = x.shape
    total = n * c * h * w

    # Lane-dense 2-D view.  Reshape of a contiguous array is free; a (tiny,
    # <128 element) pad is only emitted when total is not a lane multiple.
    flat = jnp.reshape(x, (-1,))
    padded = pl.cdiv(total, _LANES) * _LANES
    if padded != total:
        flat = jnp.pad(flat, (0, padded - total))
    rows = padded // _LANES
    x2d = jnp.reshape(flat, (rows, _LANES))

    tile_rows = min(max_tile_rows, rows)        # whole-array block when small
    num_blocks = pl.cdiv(rows, tile_rows)
    blocks_per_core = pl.cdiv(num_blocks, _NCORES)

    def x_index_map(p, i):
        blk = p * blocks_per_core + i
        # Logical blocks past the end (odd block counts / tiny inputs) are
        # clamped onto the last real block; the in-kernel mask zeroes their
        # contribution, so no OOB DMA and no wrapper-side block padding.
        return (jnp.minimum(blk, num_blocks - 1), 0)

    kernel = functools.partial(
        _hloss_kernel,
        total=total,
        tile_rows=tile_rows,
        blocks_per_core=blocks_per_core,
    )

    partial_sums = pl.pallas_call(
        kernel,
        out_shape=jax.ShapeDtypeStruct((_NCORES, 1, 1), jnp.float32),
        grid_spec=pltpu.PrefetchScalarGridSpec(
            num_scalar_prefetch=0,
            grid=(_NCORES, blocks_per_core),
            in_specs=[pl.BlockSpec((tile_rows, _LANES), x_index_map)],
            out_specs=pl.BlockSpec((1, 1, 1), lambda p, i: (p, 0, 0)),
            scratch_shapes=[pltpu.VMEM((tile_rows, _LANES), jnp.float32)],
        ),
        compiler_params=pltpu.CompilerParams(
            dimension_semantics=("parallel", "arbitrary"),
        ),
    )(x2d)

    # PyTorch divides by b.size(0) * b.size(2) * b.size(3) = N * H * W.
    return jnp.sum(partial_sums) / jnp.float32(n * h * w)


def _hloss_ref(x):
    xf = x.astype(jnp.float32)
    logsig = jnp.minimum(xf, 0.0) - jnp.log1p(jnp.exp(-jnp.abs(xf)))
    b = -jax.nn.sigmoid(xf) * logsig
    n, c, h, w = x.shape
    return jnp.sum(b) / jnp.float32(n * h * w)


if __name__ == "__main__":
    key = jax.random.PRNGKey(0)

    # 1) Primary shape from the spec (lane-aligned, single block per core).
    x = jax.random.normal(key, (2, 4, 16, 16), dtype=jnp.float32)
    out = jax.block_until_ready(hloss(x))
    ref = jax.block_until_ready(_hloss_ref(x))
    assert jnp.allclose(out, ref, rtol=1e-5, atol=1e-5), (out, ref)

    # 2) Ragged total (210 elements): exercises the in-kernel lane mask + pad.
    x2 = jax.random.normal(jax.random.fold_in(key, 1), (2, 3, 5, 7), jnp.float32)
    out2 = jax.block_until_ready(hloss(x2))
    ref2 = jax.block_until_ready(_hloss_ref(x2))
    assert jnp.allclose(out2, ref2, rtol=1e-5, atol=1e-5), (out2, ref2)

    # 3) Multi-block / dual-core split path (small tile forces 3 blocks,
    #    including a partial last block and a clamped overhang block).
    x3 = jax.random.normal(jax.random.fold_in(key, 2), (2, 5, 16, 16), jnp.float32)
    out3 = jax.block_until_ready(hloss(x3, max_tile_rows=8))
    ref3 = jax.block_until_ready(_hloss_ref(x3))
    assert jnp.allclose(out3, ref3, rtol=1e-5, atol=1e-5), (out3, ref3)

    print("KERNEL_OK")
</pallas_src>

<mosaic_0001>
module attributes {stable_mosaic.version = 11 : i64} {
  func.func @_hloss_kernel(%arg0: i32, %arg1: i32, %arg2: memref<16x128xf32, #tpu.memory_space<vmem>>, %arg3: memref<1x1x1xf32, #tpu.memory_space<vmem>>, %arg4: memref<16x128xf32, #tpu.memory_space<vmem>>) attributes {dimension_semantics = [#tpu.dimension_semantics<parallel>, #tpu.dimension_semantics<arbitrary>], iteration_bounds = array<i64: 2, 1>, scalar_prefetch = 0 : i64, scratch_operands = 1 : i64, tpu.core_type = #tpu.core_type<tc>, window_params = [{transform_indices = @transform_0, window_bounds = array<i64: 16, 128>}, {transform_indices = @transform_1, window_bounds = array<i64: 1, 1, 1>}]} {
    %c0_i32 = arith.constant 0 : i32
    %0 = arith.cmpi eq, %arg1, %c0_i32 : i32
    %1 = arith.extui %0 : i1 to i32
    %c0_i32_0 = arith.constant 0 : i32
    %2 = arith.cmpi ne, %1, %c0_i32_0 : i32
    scf.if %2 {
      %cst_17 = arith.constant 0.000000e+00 : f32
      %46 = vector.broadcast %cst_17 : f32 to vector<16x128xf32>
      %c0_18 = arith.constant 0 : index
      %c0_19 = arith.constant 0 : index
      %47 = vector.load %arg4[%c0_18, %c0_19] : memref<16x128xf32, #tpu.memory_space<vmem>>, vector<16x128xf32>
      tpu.vector_store %arg4[%c0_18, %c0_19], %46 {strides = array<i32>} : memref<16x128xf32, #tpu.memory_space<vmem>>, vector<16x128xf32>,
    } else {
    }
    %c0 = arith.constant 0 : index
    %c0_1 = arith.constant 0 : index
    %3 = vector.load %arg2[%c0, %c0_1] : memref<16x128xf32, #tpu.memory_space<vmem>>, vector<16x128xf32>
    %c1_i32 = arith.constant 1 : i32
    %4 = arith.muli %arg0, %c1_i32 : i32
    %5 = arith.addi %4, %arg1 : i32
    %c16_i32 = arith.constant 16 : i32
    %6 = arith.muli %5, %c16_i32 : i32
    %7 = tpu.iota {dimensions = array<i32: 0>} : vector<16x128xi32>
    %8 = vector.broadcast %6 : i32 to vector<16x128xi32>
    %9 = arith.addi %7, %8 : vector<16x128xi32>
    %10 = tpu.iota {dimensions = array<i32: 1>} : vector<16x128xi32>
    %c16_i32_2 = arith.constant 16 : i32
    %11 = vector.broadcast %c16_i32_2 : i32 to vector<16x128xi32>
    %12 = arith.cmpi slt, %9, %11 : vector<16x128xi32>
    %c16_i32_3 = arith.constant 16 : i32
    %13 = vector.broadcast %c16_i32_3 : i32 to vector<16x128xi32>
    %14 = arith.cmpi eq, %9, %13 : vector<16x128xi32>
    %c0_i32_4 = arith.constant 0 : i32
    %15 = vector.broadcast %c0_i32_4 : i32 to vector<16x128xi32>
    %16 = arith.cmpi slt, %10, %15 : vector<16x128xi32>
    %17 = arith.andi %14, %16 : vector<16x128xi1>
    %18 = arith.ori %12, %17 : vector<16x128xi1>
    %19 = math.absf %3 : vector<16x128xf32>
    %cst = arith.constant 0.000000e+00 : f32
    %20 = vector.broadcast %cst : f32 to vector<16x128xf32>
    %21 = arith.subf %20, %19 : vector<16x128xf32>
    %22 = math.exp %21 : vector<16x128xf32>
    %cst_5 = arith.constant 0.000000e+00 : f32
    %23 = vector.broadcast %cst_5 : f32 to vector<16x128xf32>
    %24 = arith.minimumf %3, %23 : vector<16x128xf32>
    %25 = math.log1p %22 : vector<16x128xf32>
    %26 = arith.subf %24, %25 : vector<16x128xf32>
    %cst_6 = arith.constant 1.000000e+00 : f32
    %27 = vector.broadcast %cst_6 : f32 to vector<16x128xf32>
    %28 = arith.addf %27, %22 : vector<16x128xf32>
    %cst_7 = arith.constant 1.000000e+00 : f32
    %29 = vector.broadcast %cst_7 : f32 to vector<16x128xf32>
    %30 = arith.divf %29, %28 : vector<16x128xf32>
    %cst_8 = arith.constant 0.000000e+00 : f32
    %31 = vector.broadcast %cst_8 : f32 to vector<16x128xf32>
    %32 = arith.cmpf oge, %3, %31 : vector<16x128xf32>
    %33 = arith.mulf %22, %30 : vector<16x128xf32>
    %34 = arith.select %32, %30, %33 : vector<16x128xi1>, vector<16x128xf32>
    %cst_9 = arith.constant 0.000000e+00 : f32
    %35 = vector.broadcast %cst_9 : f32 to vector<16x128xf32>
    %36 = arith.subf %35, %34 : vector<16x128xf32>
    %37 = arith.mulf %36, %26 : vector<16x128xf32>
    %cst_10 = arith.constant 0.000000e+00 : f32
    %38 = vector.broadcast %cst_10 : f32 to vector<16x128xf32>
    %39 = arith.select %18, %37, %38 : vector<16x128xi1>, vector<16x128xf32>
    %c0_11 = arith.constant 0 : index
    %c0_12 = arith.constant 0 : index
    %40 = vector.load %arg4[%c0_11, %c0_12] : memref<16x128xf32, #tpu.memory_space<vmem>>, vector<16x128xf32>
    %41 = arith.addf %40, %39 : vector<16x128xf32>
    %c0_13 = arith.constant 0 : index
    %c0_14 = arith.constant 0 : index
    %42 = vector.load %arg4[%c0_13, %c0_14] : memref<16x128xf32, #tpu.memory_space<vmem>>, vector<16x128xf32>
    tpu.vector_store %arg4[%c0_13, %c0_14], %41 {strides = array<i32>} : memref<16x128xf32, #tpu.memory_space<vmem>>, vector<16x128xf32>,
    %c0_i32_15 = arith.constant 0 : i32
    %43 = arith.cmpi eq, %arg1, %c0_i32_15 : i32
    %44 = arith.extui %43 : i1 to i32
    %c0_i32_16 = arith.constant 0 : i32
    %45 = arith.cmpi ne, %44, %c0_i32_16 : i32
    scf.if %45 {
      %c0_17 = arith.constant 0 : index
      %c0_18 = arith.constant 0 : index
      %46 = vector.load %arg4[%c0_17, %c0_18] : memref<16x128xf32, #tpu.memory_space<vmem>>, vector<16x128xf32>
      %47 = vector.shape_cast %46 : vector<16x128xf32> to vector<1x16x128xf32>
      %cst_19 = arith.constant dense<0.000000e+00> : vector<1xf32>
      %48 = vector.multi_reduction <add>, %47, %cst_19 [1, 2] : vector<1x16x128xf32> to vector<1xf32>
      %49 = vector.shape_cast %48 : vector<1xf32> to vector<1x1x1xf32>
      %50 = vector.extract %49[0, 0, 0] : f32 from vector<1x1x1xf32>
      %51 = vector.broadcast %50 : f32 to vector<1x1x1xf32>
      %c0_20 = arith.constant 0 : index
      %c0_21 = arith.constant 0 : index
      %c0_22 = arith.constant 0 : index
      %52 = vector.load %arg3[%c0_20, %c0_21, %c0_22] : memref<1x1x1xf32, #tpu.memory_space<vmem>>, vector<1x1x1xf32>
      tpu.vector_store %arg3[%c0_20, %c0_21, %c0_22], %51 {strides = array<i32>} : memref<1x1x1xf32, #tpu.memory_space<vmem>>, vector<1x1x1xf32>,
    } else {
    }
    return
  }
  func.func @transform_0(%arg0: i32, %arg1: i32) -> (i32, i32) {
    %c1_i32 = arith.constant 1 : i32
    %0 = arith.muli %arg0, %c1_i32 : i32
    %1 = arith.addi %0, %arg1 : i32
    %c0_i32 = arith.constant 0 : i32
    %2 = arith.minsi %1, %c0_i32 : i32
    %c0_i32_0 = arith.constant 0 : i32
    %c0_i32_1 = arith.constant 0 : i32
    return %2, %c0_i32_0 : i32, i32
  }
  func.func @transform_1(%arg0: i32, %arg1: i32) -> (i32, i32, i32) {
    %c0_i32 = arith.constant 0 : i32
    %c0_i32_0 = arith.constant 0 : i32
    %c0_i32_1 = arith.constant 0 : i32
    return %arg0, %c0_i32, %c0_i32_0 : i32, i32, i32
  }
}

</mosaic_0001>

<bundles_post_ra>
// kernel: tpu_custom_call.1
= control target key start
LH: loop header
LB: loop body
LE: loop exit
PB: predicated region body
PF: predicated region fallthrough
CT: control target
= control target key end

     0   :  { %6 = vsyncpa [#allocation4], 0  ;;  %s588_s0 = inlined_call_operand.hbm [shape: f32[16,128], index: 0, kind: input, shape index: {}]   ;;  %s589_s1 = inlined_call_operand.vmem [shape: f32[2,1,1], index: 1, kind: output, shape index: {}]  }
   0x1   :  { %8 = vsyncpa [#allocation4 + $0x1], 0  ;;  %s500_s6 = smov 0   ;;  %s502_s7 = smov 0  }
   0x2   :  { %s504_s8 = smov 0   ;;  %s506_s9 = smov 0  }
   0x3   :  { %s508_s10 = smov 0  }
   0x4 LB: > { %s324_s11 = sadd.s32 4294967295, %s485_s10   ;;  %s26_s12 = sadd.s32 1, %s481_s9  ;;  %s485_s10 = sphi %s508_s10, %s14_s10   ;;  %s481_s9 = sphi %s506_s9, %s600_s9   ;;  %s477_s8 = sphi %s504_s8, %s599_s8   ;;  %s473_s7 = sphi %s502_s7, %s578_s7   ;;  %s469_s6 = sphi %s500_s6, %s598_s6  }
   0x5   : > { %p28_p0 = scmp.ge.s32.totalorder %s26_s12, 2  ;;  %p466_p1 = scmp.ne.s32.totalorder %s473_s7, 0 }
   0x6   : > { %p47_p2 = scmp.eq.s32.totalorder %s485_s10, 0  ;;  %p52_p3 = scmp.ne.s32.totalorder %s473_s7, %s469_s6 }
   0x7   : > { %s602_s12 = smov (%p28_p0, %s26_s12), 0  ;;  %p53_p4 = scmp.eq.s32.totalorder %s324_s11, 0 }
   0x8   : > { %p48_p5 = por %p466_p1, %p47_p2  ;;  %p345_p7 = scmp.lt.s32.totalorder %s485_s10, 2 }
   0x9   : > { %p530_p6 = por %p53_p4, %p52_p3  ;;  %s487_s14 = smov [#allocation3]  }
   0xa   : > { %s116_s15 = sshll.u32 %s487_s14, 4  ;;  %p535_p8 = pnand %p345_p7, %p48_p5  ;;  %s117_s15 = int_to_ptr.vmem [resolvable:$true] %s116_s15 }
   0xb   : > { %s592_s13 = scalar_select %p530_p6, 1, 0 }
   0xc   : > { %s593_s16 = scalar_select %p535_p8, 1, 0 }
   0xd   : > { %s408_s19 = scalar_lea.hbm %s588_s0, 256  ;;  %p410_p10 = pneg %p535_p8 }
   0xe   : > { %p409_p9 = scmp.ne.s32.totalorder %s588_s0, %s408_s19  ;;  %p415_p13 = scmp.lt.u32.totalorder %s408_s19, %s408_s19 }
   0xf   : > { %p417_p0 = scmp.lt.u32.totalorder %s408_s19, %s588_s0 }
  0x10   : > { %p411_p11 = pnand %p410_p10, %p409_p9 }
  0x11   : > { %p418_p1 = por %p417_p0, %p415_p13 }
  0x12   : > { %p412_p12 = pneg %p411_p11 }
  0x14   : > { %p419_p2 = pnand %p418_p1, %p412_p12 }
  0x16   : > { %422 = shalt.err (!%p419_p2)
}
  0x17   : > { %s423_s24 = scalar_lea.vmem %s117_s15, 256  ;;  %s430_s25 = scalar_lea.vmem %s117_s15, 512 }
  0x18   : > { %p424_p3 = scmp.ne.s32.totalorder %s117_s15, %s423_s24  ;;  %p431_p7 = scmp.lt.s32.totalorder %s117_s15, %s117_s15 }
  0x19   : > { %p432_p6 = scmp.lt.s32.totalorder %s430_s25, %s423_s24 }
  0x1a   : > { %p426_p4 = pnand %p424_p3, %p410_p10 }
  0x1b   : > { %p433_p8 = por %p432_p6, %p431_p7 }
  0x1c   : > { %p427_p5 = pneg %p426_p4 }
  0x1e   : > { %p434_p9 = pnand %p433_p8, %p427_p5 }
  0x20   : > { %437 = shalt.err (!%p434_p9)
}
  0x21   : > { %s488_s26 = smov 128   ;;  %s489_s27 = smov 8  }
  0x22   : > { %p594_p11 = scmp.ne.s32.totalorder %s593_s16, 0  ;;  %p331_p12 = scmp.ge.s32.totalorder %s485_s10, 1 }
  0x23   : > { %p124_p13 = scmp.lt.s32.totalorder %s485_s10, 3 }
  0x24   : > { %344 = dma.hbm_to_vmem [thread:$0]  (!%p594_p11), %s588_s0, 256, %s117_s15, [#allocation4], %s488_s26, %s488_s26, %s489_s27  }
  0x25   : > { %p125_p10 = pnand %p331_p12, %p124_p13 }
  0x26   : > { %s130_s30 = sand.u32 (!%p125_p10), 1, %s473_s7   ;;  %p595_p6 = scmp.ne.s32.totalorder (!%p125_p10), %s592_s13, 0 }
  0x27   : > { %128 = sbr.rel (%p125_p10) target bundleno = 297 (0x129), region = 24  ;;  %s332_s2 = sshll.u32 (!%p125_p10), %s130_s30, 4 }
  0x28   : > { %s131_s3 = scalar_lea.sflag (!%p125_p10), [#allocation4], %s130_s30  ;;  %s134_s4 = scalar_lea.vmem (!%p125_p10), [#allocation3], %s332_s2 }
  0x2e   : > { %463 = dma.done.wait (%p595_p6), %s131_s3, 256  }
  0x2f   : > { %465 = vsyncadd (%p595_p6), %s131_s3, 4294967040  ;;  %v164_v0 = vld [vmem:[%s134_s4] sm:$0xff]  ;;  %v165_v1 = vld [vmem:[%s134_s4 + $0x8] sm:$0xff]  ;;  %v168_v13 = vlaneseq  ;;  %s333_s5 = sshll.u32 %s477_s8, 4  ;;  %p155_p8 = scmp.lt.s32.totalorder %s477_s8, 1  ;;  %vm255_vm6 = vcmask 0  }
  0x30   : > { %v185_v2 = vand.u32 2147483647, %v164_v0  ;;  %v186_v3 = vand.u32 2147483647, %v165_v1  ;;  %v171_v20 = vstv %s333_s5  ;;  %v193_v24 = vmin.f32 %v164_v0, 0.0 }
  0x31   : > { %v169_v16 = vshrl.u32 %v168_v13, 7  ;;  %v194_v28 = vmin.f32 %v165_v1, 0.0  ;;  %vm221_vm2 = vcmp.ge.f32.partialorder %v164_v0, 0.0  ;;  %vm222_vm3 = vcmp.ge.f32.partialorder %v165_v1, 0.0  ;;  %s604_s8 = smov (!%p155_p8, %s477_s8), 1 }
  0x32   : > { %v187_v4 = vsub.f32 0.0, %v185_v2  ;;  %v188_v5 = vsub.f32 0.0, %v186_v3  ;;  %s157_s13 = scalar_lea.vmem %s589_s1, %s604_s8 }
  0x33   : > { %v170_v23 = vadd.s32 8, %v169_v16  ;;  %v172_v33 = vadd.s32 %v171_v20, %v169_v16 }
  0x34   : > { %v189_v6 = vmul.f32 1.442695, %v187_v4  ;;  %v191_v7 = vmul.f32 1.442695, %v188_v5 }
  0x35   : > { %v173_v36 = vadd.s32 %v171_v20, %v170_v23  ;;  %vm176_vm4 = vcmp.lt.s32.totalorder %v172_v33, 16 }
  0x36   : > { %396 = vpow2.f32 %v189_v6 }
  0x37   : > { %398 = vpow2.f32 %v191_v7  ;;  %vm177_vm5 = vcmp.lt.s32.totalorder %v173_v36, 16 }
  0x40   : > { %v397_v8 = vpop.eup %396 }
  0x41   : > { %v399_v9 = vpop.eup %398  ;;  %v195_v10 = vadd.f32 1.0, %v397_v8  ;;  %v198_v12 = vmul.f32 -0.5, %v397_v8  ;;  %v201_v17 = vand.u32 2147483647, %v397_v8 }
  0x42   : > { %v204_v11 = vadd.f32 1.0, %v399_v9  ;;  %v207_v14 = vmul.f32 -0.5, %v399_v9  ;;  %v210_v19 = vand.u32 2147483647, %v399_v9 }
  0x43   : > { %400 = vlog2.f32 %v195_v10  ;;  %v199_v15 = vadd.f32 1.0, %v198_v12  ;;  %vm563_vm0 = vcmp.lt.f32.partialorder %v201_v17, 0.0004427343 }
  0x44   : > { %402 = vlog2.f32 %v204_v11  ;;  %v208_v18 = vadd.f32 1.0, %v207_v14  ;;  %vm211_vm1 = vcmp.lt.f32.partialorder %v210_v19, 0.0004427343 }
  0x45   : > { %404 = vrcp.f32 %v195_v10  ;;  %v200_v21 = vmul.f32 %v397_v8, %v199_v15 }
  0x46   : > { %406 = vrcp.f32 %v204_v11  ;;  %v209_v26 = vmul.f32 %v399_v9, %v208_v18 }
  0x4d   : > { %v401_v22 = vpop.eup %400 }
  0x4e   : > { %v403_v27 = vpop.eup %402  ;;  %v197_v29 = vmul.f32 0.6931472, %v401_v22 }
  0x4f   : > { %v405_v30 = vpop.eup %404  ;;  %v206_v31 = vmul.f32 0.6931472, %v403_v27 }
  0x50   : > { %v407_v32 = vpop.eup %406  ;;  %v203_v34 = vsel %vm563_vm0, %v200_v21, %v197_v29  ;;  %v223_v35 = vmul.f32 %v405_v30, %v397_v8 }
  0x51   : > { %v212_v37 = vsel %vm211_vm1, %v209_v26, %v206_v31  ;;  %v213_v38 = vsub.f32 %v193_v24, %v203_v34  ;;  %v224_v39 = vmul.f32 %v407_v32, %v399_v9 }
  0x52   : > { %v214_v40 = vsub.f32 %v194_v28, %v212_v37  ;;  %v225_v41 = vsel %vm221_vm2, %v405_v30, %v223_v35 }
  0x53   : > { %v226_v42 = vsel %vm222_vm3, %v407_v32, %v224_v39  ;;  %v227_v43 = vsub.f32 0.0, %v225_v41 }
  0x54   : > { %v228_v44 = vsub.f32 0.0, %v226_v42 }
  0x55   : > { %v229_v45 = vmul.f32 %v227_v43, %v213_v38 }
  0x56   : > { %v230_v46 = vmul.f32 %v228_v44, %v214_v40 }
  0x57   : > { %v231_v47 = vsel %vm176_vm4, %v229_v45, 0.0 }
  0x58   : > { %v232_v48 = vsel %vm177_vm5, %v230_v46, 0.0 }
  0x59   : > { %v244_v49 = vadd.f32 %v232_v48, %v231_v47 }
  0x5b   : > { %245 = vadd.xlane.f32.xlu0 %v244_v49 }
  0xe8   : > { %v246_v50 = vpop.xlane.xlu0 %245 }
  0xe9   : > { %v247_v51 = vrot.slane %v246_v50, 4 }
  0xeb   : > { %v248_v52 = vadd.f32 %v247_v51, %v246_v50 }
  0xed   : > { %v249_v53 = vrot.slane %v248_v52, 2 }
  0xef   : > { %v250_v54 = vadd.f32 %v249_v53, %v248_v52 }
  0xf1   : > { %v251_v55 = vrot.slane %v250_v54, 1 }
  0xf3   : > { %v252_v56 = vadd.f32 %v251_v55, %v250_v54 }
  0xf5   : > { %337 = vpush %v252_v56 }
 0x126   : > { %s338_s14 = spop %337 }
 0x127   : > { %v254_v57 = vstv %s338_s14 }
 0x128   : > { %256 = vst.msk [vmem:[%s157_s13] sm:$0x1] %vm255_vm6, %v254_v57 }
 0x129 PF: > { %s14_s10 = sadd.s32 1, %s485_s10   ;;  %s598_s6 = smov %s473_s7 }
 0x12a   : > { %p11_p0 = scmp.ge.s32.totalorder %s14_s10, 4   ;;  %s578_s7 = smov 0  }
 0x12b   : > { %s599_s8 = smov %s481_s9  ;;  %s600_s9 = smov %s602_s12 }
 0x12c   :  { %13 = sbr.rel (!%p11_p0) target bundleno = 4 (0x4), region = 72 }
 0x133   :  { %274 = vsyncpa [#allocation4], 1 }
 0x134   :  { %276 = vsyncpa [#allocation4 + $0x1], 1 }

</bundles_post_ra>
